<compile_context>
chip_gen: v6e
topology: v6e:2x2x1
jax: 0.10.0
libtpu: 0.0.40
codegen_flags: <defaults>
</compile_context>

<pallas_src>
import functools

import jax
import jax.numpy as jnp
from jax import lax
from jax.experimental import pallas as pl
from jax.experimental.pallas import tpu as pltpu

LANE = 128
_SUBLANE_CHUNK = 512      # fori-loop chunk (sublanes) inside the single-pass kernel
_TILE_SUBLANES = 8192     # D-tile (sublanes) for the two-pass path: 4 MiB f32 / buffer


def _tpu_vmem_capacity_bytes():
    """Physical VMEM per core; falls back to the smallest (v7x, 64 MiB)."""
    try:
        return int(pltpu.get_tpu_info().vmem_capacity_bytes)
    except Exception:
        return 64 * 1024 * 1024


def _vnorm_row_kernel(x_ref, o_ref, *, inv_d, chunk, n_full, rem):
    """Single pass: one flattened batch row as a (1, S, 128) slab.

    Both the sum-of-squares and the normalize sweep are chunked over sublanes
    so f32 intermediates stay chunk-sized (no full-row f32 temp in VMEM).
    """

    def ssq_chunk(start, size):
        xs = x_ref[0, pl.ds(start, size), :].astype(jnp.float32)
        return jnp.sum(xs * xs, axis=0, keepdims=True)        # (1, LANE) partial

    acc = jnp.zeros((1, LANE), jnp.float32)
    if n_full > 0:
        def body(j, a):
            start = pl.multiple_of(j * chunk, chunk)
            return a + ssq_chunk(start, chunk)
        acc = lax.fori_loop(0, n_full, body, acc)
    if rem > 0:
        acc = acc + ssq_chunk(n_full * chunk, rem)

    # 1 / sqrt(mean(x^2)); zero-padded lane tail adds 0, we divide by true D.
    scale = lax.rsqrt(jnp.sum(acc) * inv_d)                    # f32 scalar (EUP)

    def write_chunk(start, size):
        xs = x_ref[0, pl.ds(start, size), :].astype(jnp.float32)
        o_ref[0, pl.ds(start, size), :] = (xs * scale).astype(o_ref.dtype)

    if n_full > 0:
        def wbody(j, carry):
            start = pl.multiple_of(j * chunk, chunk)
            write_chunk(start, chunk)
            return carry
        lax.fori_loop(0, n_full, wbody, 0)
    if rem > 0:
        write_chunk(n_full * chunk, rem)


def _ssq_scale_kernel(x_ref, scale_ref, acc_ref, *, inv_d, rem):
    """Two-pass, pass 1: per-row sum of squares over D tiles -> rsqrt scale."""
    k = pl.program_id(1)
    last = pl.num_programs(1) - 1

    @pl.when(k == 0)
    def _():
        acc_ref[...] = jnp.zeros_like(acc_ref)

    xf = x_ref[...].astype(jnp.float32)                        # (1, TILE, LANE)
    if rem:
        # Partial last K tile: sublanes >= rem hold out-of-bounds garbage.
        valid = jnp.where(k == last, rem, xf.shape[1])
        ids = lax.broadcasted_iota(jnp.int32, xf.shape, 1)
        xf = jnp.where(ids < valid, xf, 0.0)

    # Lane-shaped partial: cross-vreg VALU adds + one tiny sublane reduce/tile.
    acc_ref[...] += jnp.sum(xf * xf, axis=1)                   # (1, LANE)

    @pl.when(k == last)
    def _():
        # Fused finalize: output is the per-row scale (EUP rsqrt is free here).
        scale_ref[...] = lax.rsqrt(jnp.sum(acc_ref[...]) * inv_d).reshape(1, 1)


def _scale_kernel(scale_ref, x_ref, o_ref):
    """Two-pass, pass 2: multiply each D tile by its row's precomputed scale."""
    sc = scale_ref[pl.program_id(0), 0]                        # f32 scalar from SMEM
    xf = x_ref[...].astype(jnp.float32)
    o_ref[...] = (xf * sc).astype(o_ref.dtype)


def variance_norm2(x, *, force_two_pass=False, tile_sublanes=_TILE_SUBLANES):
    """Pallas TPU implementation of VarianceNorm2.forward for NCHW input."""
    n, c, h, w = x.shape
    d = c * h * w
    orig_dtype = x.dtype
    itemsize = jnp.dtype(orig_dtype).itemsize
    inv_d = 1.0 / float(d)

    # Lane-dense layout: view each flattened row as an (S, 128) slab so vregs,
    # vld and vst are fully occupied.  When D % 128 == 0 (the common case) the
    # reshape is free — no extra HBM pad/slice passes.
    s = pl.cdiv(d, LANE)
    d_pad = s * LANE
    if d_pad == d:
        x3 = x.reshape(n, s, LANE)
    else:
        # TODO(synk): ragged D falls back to an XLA pad + final slice (one extra
        # HBM pass each); guarantee D % 128 == 0 upstream to avoid it.
        x3 = jnp.pad(x.reshape(n, d), ((0, 0), (0, d_pad - d))).reshape(n, s, LANE)

    # Generation-aware VMEM sizing (v5e/v6e: 128 MiB, v7x: 64 MiB per core).
    vmem_cap = _tpu_vmem_capacity_bytes()
    vmem_limit = int(min((vmem_cap * 3) // 4, 100 * 1024 * 1024))
    # Single-pass keeps a whole row resident: in + out, double-buffered = 4 row
    # buffers; give each ~1/5 of the scoped limit (chunked temps stay small).
    max_single_pass_sublanes = (vmem_limit // 5) // (LANE * itemsize)
    single_pass = (s <= max_single_pass_sublanes) and not force_two_pass

    # TODO(synk): on v7x (2 TCs/chip) consider pltpu.CORE_PARALLEL on the batch
    # axis (and a cross-core split of the K reduction when N == 1).

    if single_pass:
        chunk = _SUBLANE_CHUNK
        n_full, rem = divmod(s, chunk)
        out3 = pl.pallas_call(
            functools.partial(_vnorm_row_kernel, inv_d=inv_d, chunk=chunk,
                              n_full=n_full, rem=rem),
            out_shape=jax.ShapeDtypeStruct((n, s, LANE), orig_dtype),
            grid_spec=pltpu.PrefetchScalarGridSpec(
                num_scalar_prefetch=0,
                grid=(n,),
                in_specs=[pl.BlockSpec((1, s, LANE), lambda i: (i, 0, 0))],
                out_specs=pl.BlockSpec((1, s, LANE), lambda i: (i, 0, 0)),
            ),
            compiler_params=pltpu.CompilerParams(
                dimension_semantics=("parallel",),
                vmem_limit_bytes=vmem_limit,
            ),
            cost_estimate=pl.CostEstimate(
                flops=3 * n * d, transcendentals=n,
                bytes_accessed=2 * n * d * itemsize),
        )(x3)
    else:
        tile = min(int(tile_sublanes), s)
        k_steps = pl.cdiv(s, tile)
        rem = s % tile   # partial last K tile is masked inside pass 1

        # Pass 1: per-row scale = 1/sqrt(mean(x^2)); K axis tiled, "arbitrary".
        scale = pl.pallas_call(
            functools.partial(_ssq_scale_kernel, inv_d=inv_d, rem=rem),
            out_shape=jax.ShapeDtypeStruct((n, 1), jnp.float32),
            grid_spec=pltpu.PrefetchScalarGridSpec(
                num_scalar_prefetch=0,
                grid=(n, k_steps),
                in_specs=[pl.BlockSpec((1, tile, LANE), lambda i, k: (i, k, 0))],
                out_specs=pl.BlockSpec((1, 1), lambda i, k: (i, 0)),
                scratch_shapes=[pltpu.VMEM((1, LANE), jnp.float32)],
            ),
            compiler_params=pltpu.CompilerParams(
                dimension_semantics=("parallel", "arbitrary"),
                vmem_limit_bytes=vmem_limit,
            ),
            cost_estimate=pl.CostEstimate(
                flops=2 * n * d, transcendentals=n,
                bytes_accessed=n * d * itemsize),
        )(x3)

        # Pass 2: normalize; per-row scale lives in SMEM (no per-step DMA).
        out3 = pl.pallas_call(
            _scale_kernel,
            out_shape=jax.ShapeDtypeStruct((n, s, LANE), orig_dtype),
            grid_spec=pltpu.PrefetchScalarGridSpec(
                num_scalar_prefetch=0,
                grid=(n, k_steps),
                in_specs=[
                    pl.BlockSpec(memory_space=pltpu.MemorySpace.SMEM),
                    pl.BlockSpec((1, tile, LANE), lambda i, k: (i, k, 0)),
                ],
                out_specs=pl.BlockSpec((1, tile, LANE), lambda i, k: (i, k, 0)),
            ),
            compiler_params=pltpu.CompilerParams(
                dimension_semantics=("parallel", "parallel"),
                vmem_limit_bytes=vmem_limit,
            ),
            cost_estimate=pl.CostEstimate(
                flops=n * d, transcendentals=0,
                bytes_accessed=2 * n * d * itemsize),
        )(scale, x3)

    if d_pad == d:
        return out3.reshape(n, c, h, w)
    return out3.reshape(n, d_pad)[:, :d].reshape(n, c, h, w)


if __name__ == "__main__":
    key = jax.random.PRNGKey(0)

    def ref_fn(v):
        var = jnp.sqrt(jnp.mean(v ** 2, axis=(-1, -2, -3), keepdims=True))
        return v / var

    # Small NCHW input (feature_num = C, unused by the forward math).
    x = jax.random.normal(key, (2, 4, 16, 16), dtype=jnp.float32)

    # Fast single-pass path.
    out = jax.block_until_ready(variance_norm2(x))
    assert out.shape == x.shape
    assert jnp.allclose(out, ref_fn(x), atol=1e-5, rtol=1e-5)

    # Tiled two-pass path (forced).
    out2 = jax.block_until_ready(variance_norm2(x, force_two_pass=True))
    assert jnp.allclose(out2, ref_fn(x), atol=1e-5, rtol=1e-5)

    # Two-pass with a partial last K tile (s=20, tile=8 -> masked ragged tail).
    x_r = jax.random.normal(key, (2, 4, 16, 40), dtype=jnp.float32)
    out3 = jax.block_until_ready(
        variance_norm2(x_r, force_two_pass=True, tile_sublanes=8))
    assert jnp.allclose(out3, ref_fn(x_r), atol=1e-5, rtol=1e-5)

    print("KERNEL_OK")
</pallas_src>

<mosaic_0001>
module attributes {stable_mosaic.version = 11 : i64} {
  func.func @_vnorm_row_kernel(%arg0: i32, %arg1: memref<1x8x128xf32, #tpu.memory_space<vmem>>, %arg2: memref<1x8x128xf32, #tpu.memory_space<vmem>>) attributes {dimension_semantics = [#tpu.dimension_semantics<parallel>], iteration_bounds = array<i64: 2>, scalar_prefetch = 0 : i64, scratch_operands = 0 : i64, tpu.core_type = #tpu.core_type<tc>, window_params = [{transform_indices = @transform_0, window_bounds = array<i64: 1, 8, 128>}, {transform_indices = @transform_1, window_bounds = array<i64: 1, 8, 128>}]} {
    %cst = arith.constant 0.000000e+00 : f32
    %0 = vector.broadcast %cst : f32 to vector<1x128xf32>
    %c0 = arith.constant 0 : index
    %c0_0 = arith.constant 0 : index
    %c0_1 = arith.constant 0 : index
    %1 = vector.load %arg1[%c0, %c0_0, %c0_1] : memref<1x8x128xf32, #tpu.memory_space<vmem>>, vector<1x8x128xf32>
    %2 = vector.shape_cast %1 : vector<1x8x128xf32> to vector<8x128xf32>
    %3 = arith.mulf %2, %2 : vector<8x128xf32>
    %cst_2 = arith.constant dense<0.000000e+00> : vector<128xf32>
    %4 = vector.multi_reduction <add>, %3, %cst_2 [0] : vector<8x128xf32> to vector<128xf32>
    %5 = vector.shape_cast %4 : vector<128xf32> to vector<1x128xf32>
    %6 = arith.addf %0, %5 : vector<1x128xf32>
    %7 = vector.shape_cast %6 : vector<1x128xf32> to vector<1x1x128xf32>
    %cst_3 = arith.constant dense<0.000000e+00> : vector<1xf32>
    %8 = vector.multi_reduction <add>, %7, %cst_3 [1, 2] : vector<1x1x128xf32> to vector<1xf32>
    %9 = vector.shape_cast %8 : vector<1xf32> to vector<1x1x1xf32>
    %10 = vector.extract %9[0, 0, 0] : f32 from vector<1x1x1xf32>
    %cst_4 = arith.constant 9.765625E-4 : f32
    %11 = arith.mulf %10, %cst_4 : f32
    %12 = math.rsqrt %11 : f32
    %c0_5 = arith.constant 0 : index
    %c0_6 = arith.constant 0 : index
    %c0_7 = arith.constant 0 : index
    %13 = vector.load %arg1[%c0_5, %c0_6, %c0_7] : memref<1x8x128xf32, #tpu.memory_space<vmem>>, vector<1x8x128xf32>
    %14 = vector.shape_cast %13 : vector<1x8x128xf32> to vector<8x128xf32>
    %15 = vector.broadcast %12 : f32 to vector<8x128xf32>
    %16 = arith.mulf %14, %15 : vector<8x128xf32>
    %c0_8 = arith.constant 0 : index
    %c0_9 = arith.constant 0 : index
    %c0_10 = arith.constant 0 : index
    %17 = vector.load %arg2[%c0_8, %c0_9, %c0_10] : memref<1x8x128xf32, #tpu.memory_space<vmem>>, vector<1x8x128xf32>
    %18 = vector.shape_cast %17 : vector<1x8x128xf32> to vector<8x128xf32>
    %19 = vector.shape_cast %16 : vector<8x128xf32> to vector<1x8x128xf32>
    tpu.vector_store %arg2[%c0_8, %c0_9, %c0_10], %19 {strides = array<i32>} : memref<1x8x128xf32, #tpu.memory_space<vmem>>, vector<1x8x128xf32>,
    return
  }
  func.func @transform_0(%arg0: i32) -> (i32, i32, i32) {
    %c0_i32 = arith.constant 0 : i32
    %c0_i32_0 = arith.constant 0 : i32
    %c0_i32_1 = arith.constant 0 : i32
    return %arg0, %c0_i32, %c0_i32_0 : i32, i32, i32
  }
  func.func @transform_1(%arg0: i32) -> (i32, i32, i32) {
    %c0_i32 = arith.constant 0 : i32
    %c0_i32_0 = arith.constant 0 : i32
    %c0_i32_1 = arith.constant 0 : i32
    return %arg0, %c0_i32, %c0_i32_0 : i32, i32, i32
  }
}

</mosaic_0001>

<bundles_post_ra>
// kernel: tpu_custom_call.1
= control target key start
LH: loop header
LB: loop body
LE: loop exit
PB: predicated region body
PF: predicated region fallthrough
CT: control target
= control target key end

     0   :  { %6 = vsyncpa [#allocation3], 0  ;;  %s558_s0 = inlined_call_operand.hbm [shape: f32[2,8,128], index: 0, kind: input, shape index: {}]   ;;  %s559_s1 = inlined_call_operand.hbm [shape: f32[2,8,128], index: 1, kind: output, shape index: {}]  }
   0x1   :  { %8 = vsyncpa [#allocation3 + $0x1], 0 }
   0x2   :  { %9 = vsyncpa [#allocation4], 0 }
   0x3   :  { %11 = vsyncpa [#allocation4 + $0x1], 0  ;;  %s413_s6 = smov 0   ;;  %s415_s7 = smov 0  }
   0x4   :  { %s417_s8 = smov 0   ;;  %s419_s9 = smov 0  }
   0x5 LB: > { %s434_s10 = sadd.s32 4294967295, %s399_s9   ;;  %s243_s11 = sadd.s32 4294967294, %s399_s9   ;;  %s399_s9 = sphi %s419_s9, %s576_s9   ;;  %s395_s8 = sphi %s417_s8, %s575_s8   ;;  %s391_s7 = sphi %s415_s7, %s574_s7   ;;  %s387_s6 = sphi %s413_s6, %s573_s6  }
   0x6   : > { %s438_s12 = sadd.s32 1, %s399_s9   ;;  %s24_s13 = sadd.s32 1, %s395_s8 }
   0x7   : > { %s21_s14 = ssub.s32 %s399_s9, %s438_s12  ;;  %p31_p0 = scmp.ne.s32.totalorder %s395_s8, %s391_s7 }
   0x8   : > { %p22_p1 = scmp.eq.s32.totalorder %s21_s14, 0  ;;  %p32_p2 = scmp.eq.s32.totalorder %s399_s9, 0 }
   0x9   : > { %p37_p3 = scmp.ne.s32.totalorder %s391_s7, %s387_s6  ;;  %p38_p4 = scmp.eq.s32.totalorder %s434_s10, 0 }
   0xa   : > { %s450_s15 = scalar_select %p22_p1, %s395_s8, %s24_s13  }
   0xb   : > { %p452_p5 = por %p32_p2, %p31_p0  ;;  %p456_p6 = por %p38_p4, %p37_p3 }
   0xc   : > { %p61_p7 = scmp.eq.s32.totalorder %s434_s10, 1  ;;  %p67_p8 = scmp.eq.s32.totalorder %s243_s11, 1 }
   0xd   : > { %s563_s17 = scalar_select %p456_p6, 1, 0 }
   0xe   : > { %p271_p10 = scmp.lt.s32.totalorder %s399_s9, 2  ;;  %p463_p11 = por %p61_p7, %p31_p0 }
   0xf   : > { %p467_p12 = por %p67_p8, %p37_p3  ;;  %s87_s20 = sand.u32 1, %s395_s8  }
  0x10   : > { %s564_s18 = scalar_select %p463_p11, 1, 0 }
  0x11   : > { %s565_s19 = scalar_select %p467_p12, 1, 0 }
  0x12   : > { %s247_s21 = sshll.u32 %s399_s9, 7  ;;  %s246_s22 = sshll.u32 %s87_s20, 3 }
  0x13   : > { %s476_s25 = scalar_lea.hbm %s558_s0, %s247_s21  ;;  %s91_s26 = scalar_lea.vmem [#allocation2], %s246_s22 }
  0x14   : > { %s98_s27 = sshll.u32 %s91_s26, 4  ;;  %p480_p13 = pnand %p271_p10, %p452_p5  ;;  %s484_s27 = int_to_ptr.vmem [resolvable:$true] %s98_s27 }
  0x15   : > { %s88_s29 = scalar_lea.sflag [#allocation3], %s87_s20  ;;  %s307_s30 = scalar_lea.hbm %s476_s25, 128 }
  0x16   : > { %p308_p2 = scmp.ne.s32.totalorder %s476_s25, %s307_s30  ;;  %p309_p3 = pneg %p480_p13 }
  0x17   : > { %s312_s4 = scalar_lea.hbm %s558_s0, 256  ;;  %p313_p5 = scmp.lt.s32.totalorder %s476_s25, %s558_s0 }
  0x18   : > { %p310_p4 = pnand %p309_p3, %p308_p2  ;;  %p314_p8 = scmp.lt.s32.totalorder %s312_s4, %s307_s30 }
  0x1a   : > { %p311_p7 = pneg %p310_p4  ;;  %p315_p10 = por %p314_p8, %p313_p5 }
  0x1c   : > { %p316_p9 = pnand %p315_p10, %p311_p7 }
  0x1e   : > { %319 = shalt.err (!%p316_p9)
}
  0x1f   : > { %s320_s13 = scalar_lea.vmem %s484_s27, 128  ;;  %s401_s14 = smov [#allocation2]  }
  0x20   : > { %p321_p0 = scmp.ne.s32.totalorder %s484_s27, %s320_s13  ;;  %s325_s16 = sshll.u32 %s401_s14, 4  ;;  %s326_s16 = int_to_ptr.vmem [resolvable:$false] %s325_s16 }
  0x21   : > { %s327_s20 = scalar_lea.vmem %s326_s16, 256  ;;  %p328_p4 = scmp.lt.s32.totalorder %s484_s27, %s326_s16 }
  0x22   : > { %p323_p1 = pnand %p321_p0, %p309_p3  ;;  %p329_p12 = scmp.lt.s32.totalorder %s327_s20, %s320_s13 }
  0x24   : > { %p324_p2 = pneg %p323_p1  ;;  %p330_p11 = por %p329_p12, %p328_p4 }
  0x26   : > { %p331_p6 = pnand %p330_p11, %p324_p2 }
  0x28   : > { %334 = shalt.err (!%p331_p6)
}
  0x29   : > { %266 = dma.hbm_to_vmem [thread:$0]  (!%p480_p13), %s476_s25, 128, %s484_s27, %s88_s29  }
  0x2a   : > { %p567_p9 = scmp.lt.s32.totalorder %s399_s9, 3  ;;  %p568_p7 = scmp.ge.s32.totalorder %s399_s9, 1 }
  0x2c   : > { %p104_p0 = pnand %p568_p7, %p567_p9 }
  0x2d   : > { %s511_s21 = sand.u32 (!%p104_p0), 1, %s391_s7   ;;  %p569_p6 = scmp.ne.s32.totalorder (!%p104_p0), %s563_s17, 0 }
  0x2e   : > { %107 = sbr.rel (%p104_p0) target bundleno = 351 (0x15f), region = 24  ;;  %s249_s22 = sshll.u32 (!%p104_p0), %s511_s21, 3 }
  0x2f   : > { %s110_s23 = scalar_lea.sflag (!%p104_p0), [#allocation3], %s511_s21  ;;  %s113_s24 = scalar_lea.vmem (!%p104_p0), [#allocation2], %s249_s22 }
  0x33   : > { %378 = dma.done.wait (%p569_p6), %s110_s23, 128  }
  0x34   : > { %380 = vsyncadd (%p569_p6), %s110_s23, 4294967168  ;;  %v132_v0 = vld [vmem:[%s113_s24] sm:$0xff]  ;;  %vm141_vm0 = vcmask 1040384   ;;  %s252_s26 = sshll.u32 %s434_s10, 7  ;;  %s131_s27 = scalar_lea.vmem [#allocation5], %s249_s22 }
  0x35   : > { %v133_v1 = vmul.f32 %v132_v0, %v132_v0  ;;  %s173_s28 = sshll.u32 %s131_s27, 4  ;;  %s171_s3 = scalar_lea.hbm %s559_s1, %s252_s26  ;;  %s174_s28 = int_to_ptr.vmem [resolvable:$true] %s173_s28 }
  0x36   : > { %s160_s4 = scalar_lea.sflag [#allocation4], %s511_s21  ;;  %s335_s5 = scalar_lea.vmem %s174_s28, 128 }
  0x37   : > { %v134_v2 = vrot.slane %v133_v1, 4  ;;  %p336_p11 = scmp.ne.s32.totalorder %s174_s28, %s335_s5  ;;  %p570_p12 = scmp.ne.s32.totalorder %s564_s18, 0 }
  0x38   : > { %s402_s11 = smov [#allocation5]  }
  0x39   : > { %v135_v3 = vadd.f32 %v134_v2, %v133_v1  ;;  %p337_p13 = pnand %p336_p11, %p570_p12  ;;  %s339_s10 = sshll.u32 %s402_s11, 4  ;;  %s340_s10 = int_to_ptr.vmem [resolvable:$false] %s339_s10 }
  0x3a   : > { %s341_s13 = scalar_lea.vmem %s340_s10, 256  ;;  %p342_p3 = scmp.lt.s32.totalorder %s174_s28, %s340_s10 }
  0x3b   : > { %v136_v4 = vrot.slane %v135_v3, 2  ;;  %p338_p1 = pneg %p337_p13  ;;  %p343_p5 = scmp.lt.s32.totalorder %s341_s13, %s335_s5 }
  0x3d   : > { %v137_v5 = vadd.f32 %v136_v4, %v135_v3  ;;  %p344_p8 = por %p343_p5, %p342_p3 }
  0x3f   : > { %v138_v6 = vrot.slane %v137_v5, 1  ;;  %p345_p10 = pnand %p344_p8, %p338_p1 }
  0x41   : > { %v139_v7 = vadd.f32 %v138_v6, %v137_v5 }
  0x43   : > { %v142_v8 = vsel %vm141_vm0, %v139_v7, 0.0 }
  0x44   : > { %143 = vadd.xlane.f32.xlu0 %v142_v8 }
  0xcd   : > { %v144_v9 = vpop.xlane.xlu0 %143 }
  0xce   : > { %v145_v10 = vrot.slane %v144_v9, 4 }
  0xd0   : > { %v146_v11 = vadd.f32 %v145_v10, %v144_v9 }
  0xd2   : > { %v147_v12 = vrot.slane %v146_v11, 2 }
  0xd4   : > { %v148_v13 = vadd.f32 %v147_v12, %v146_v11 }
  0xd6   : > { %v149_v14 = vrot.slane %v148_v13, 1 }
  0xd8   : > { %v150_v15 = vadd.f32 %v149_v14, %v148_v13 }
  0xda   : > { %255 = vpush %v150_v15 }
 0x10b   : > { %s256_s17 = spop %255 }
 0x10c   : > { %s152_s25 = smul.f32 0.0009765625, %s256_s17 }
 0x10e   : > { %v153_v16 = vstv %s152_s25 }
 0x10f   : > { %305 = vrsqrt.f32 %v153_v16 }
 0x11c   : > { %v306_v17 = vpop.eup %305 }
 0x11d   : > { %257 = vpush %v306_v17 }
 0x14e   : > { %s258_s29 = spop %257 }
 0x14f   : > { %v156_v18 = vstv %s258_s29 }
 0x150   : > { %v157_v19 = vmul.f32 %v156_v18, %v132_v0 }
 0x152   : > { %158 = vst [vmem:[%s131_s27] sm:$0xff] %v157_v19 }
 0x153   : > { %348 = shalt.err (!%p345_p10)
}
 0x154   : > { %s349_s14 = scalar_lea.hbm %s171_s3, 128  ;;  %s353_s21 = scalar_lea.hbm %s559_s1, 256 }
 0x155   : > { %p350_p2 = scmp.ne.s32.totalorder %s171_s3, %s349_s14  ;;  %p354_p7 = scmp.lt.s32.totalorder %s171_s3, %s559_s1 }
 0x156   : > { %p355_p0 = scmp.lt.s32.totalorder %s353_s21, %s349_s14 }
 0x157   : > { %p351_p4 = pnand %p350_p2, %p570_p12 }
 0x158   : > { %p356_p6 = por %p355_p0, %p354_p7 }
 0x159   : > { %p352_p9 = pneg %p351_p4 }
 0x15b   : > { %p357_p11 = pnand %p356_p6, %p352_p9 }
 0x15d   : > { %360 = shalt.err (!%p357_p11)
}
 0x15e   : > { %261 = dma.vmem_to_hbm [thread:$0]  (%p570_p12), %s174_s28, 128, %s171_s3, %s160_s4  }
 0x15f PF: > { %s185_s24 = sand.u32 1, %s387_s6   ;;  %p571_p13 = scmp.ne.s32.totalorder %s565_s19, 0 }
 0x160   : > { %p572_p1 = scmp.ge.s32.totalorder %s399_s9, 2  ;;  %s186_s17 = scalar_lea.sflag [#allocation4], %s185_s24 }
 0x162   : > { %p268_p3 = pnand %p572_p1, %p571_p13 }
 0x164   : > { %p269_p5 = pneg %p268_p3 }
 0x166   : > { %382 = dma.done.wait (%p269_p5), %s186_s17, 128  }
 0x167   : > { %384 = vsyncadd (%p269_p5), %s186_s17, 4294967168  ;;  %p14_p8 = scmp.ge.s32.totalorder %s438_s12, 4   ;;  %s573_s6 = smov %s391_s7 }
 0x168   : > { %s574_s7 = smov %s395_s8  ;;  %s575_s8 = smov %s450_s15 }
 0x169   : > { %s576_s9 = smov %s438_s12  ;;  %16 = sbr.rel (!%p14_p8) target bundleno = 5 (0x5), region = 69 }
 0x16e   :  { %191 = vsyncpa [#allocation3], 1 }
 0x16f   :  { %193 = vsyncpa [#allocation3 + $0x1], 1 }
 0x170   :  { %194 = vsyncpa [#allocation4], 1 }
 0x171   :  { %196 = vsyncpa [#allocation4 + $0x1], 1 }

</bundles_post_ra>
